<compile_context>
chip_gen: v5e
topology: v5e:2x2
jax: 0.10.0
libtpu: 0.0.40
codegen_flags: <defaults>
</compile_context>

<pallas_src>
import jax
import jax.numpy as jnp
from jax.experimental import pallas as pl
from jax.experimental.pallas import tpu as pltpu

# ---------------- model dims ----------------
NODE_EMB_DIM = 16
EDGE_EMB_DIM = 16
HIDDEN = 16
LAYERS = 2
NUM_CLASSES = 6
BN_EPS = 1e-5

# ---------------- per-block graph sizes ----------------
N_NODES = 16            # nodes per block
N_EDGES = 32            # edges per block
GRAPHS_PER_BLOCK = 2    # graphs per block
NUM_BLOCKS = 4          # blocks per kernel call (grid axis, "parallel")
OUT_LANES = 128         # lane-dense logits slab (cols 0:6 hold the real logits)

# ---------------- packed per-block graph-data slab (rows x 32 lanes) ----------------
DATA_COLS = 32
D_NODE = 0                       # [16, 2]  node one-hot            rows 0..15
D_EATTR = 16                     # [32, 7]  raw edge attributes     rows 16..47
D_POOL = 48                      # [G, 16]  mean-pool matrix        rows 48..55 (padded to 8)
D_INC = 56                       # [32, 32] [src|dst] incidence     rows 56..87
D_SRCT = 88                      # [16, 32] scatter-add (src^T)     rows 88..103
DATA_ROWS = 104

# ---------------- packed parameter slab (rows x 128 lanes), all blocks 8-row aligned ----------
SLAB_COLS = 128
# per-layer block
L_WNODE = 0      # [16, 80]  fused A|D|0|E|B_s weight (bn_node_x folded into A, B)
L_WC = 16        # [16, 16]  C weight
L_WF1 = 32       # [16, 32]  ff_linear1 (norm1_ffn folded)
L_WF2 = 48       # [32, 16]  ff_linear2
L_VEC = 80       # [8, *]    packed bias/scale rows:
#   +0 b_node[1,80]  +1 bc[1,16]  +2 bne_s[1,16]  +3 bne_b[1,16]
#   +4 bf1[1,32]     +5 bf2[1,16] +6 bn2_s[1,16]  +7 bn2_b[1,16]
PER_LAYER_ROWS = 88
GBASE = LAYERS * PER_LAYER_ROWS          # 176
# global block
G_NENC = 0       # [32, 16]  node encoder, zero-padded to DATA_COLS input rows
G_EENC = 32      # [32, 16]  edge encoder, zero-padded to DATA_COLS input rows
G_HW = 64        # [16, 128] head weight, zero-padded to 128 lanes
G_VEC = 80       # [8, *]    +0 edge-encoder bias[1,16]   +1 head bias[1,128]
GLOBAL_ROWS = 88
TOTAL_PARAM_ROWS = GBASE + GLOBAL_ROWS   # 264


def gated_gcn_kernel(data_ref, p_ref, out_ref):
    """One graph block per grid step. data_ref: [104,32], p_ref: [264,128], out_ref: [G,128]."""
    f32 = jnp.float32
    H = HIDDEN

    node_blk = data_ref[D_NODE:D_NODE + N_NODES, :]                      # [16,32] (cols 2: = 0)
    edge_blk = data_ref[D_EATTR:D_EATTR + N_EDGES, :]                    # [32,32] (cols 7: = 0)
    pool = data_ref[D_POOL:D_POOL + GRAPHS_PER_BLOCK, 0:N_NODES]         # [G,16]
    inc = data_ref[D_INC:D_INC + N_EDGES, :]                             # [32,32] = [src|dst]
    srcT = data_ref[D_SRCT:D_SRCT + N_NODES, :]                          # [16,32]

    # --- encoders (weights zero-padded so the full 32-lane slab rows can be fed directly) ---
    w_nenc = p_ref[GBASE + G_NENC:GBASE + G_NENC + DATA_COLS, 0:H]       # [32,16]
    w_eenc = p_ref[GBASE + G_EENC:GBASE + G_EENC + DATA_COLS, 0:H]       # [32,16]
    gvec = p_ref[GBASE + G_VEC:GBASE + G_VEC + 8, :]                     # [8,128]
    eeb = gvec[0:1, 0:H]
    hb = gvec[1:2, :]                                                    # [1,128]

    x = jnp.dot(node_blk, w_nenc, preferred_element_type=f32)            # [16,16]
    e = jnp.dot(edge_blk, w_eenc, preferred_element_type=f32) + eeb      # [32,16]

    # --- GatedGCN layers (static Python loop -> unrolled at trace time) ---
    for l in range(LAYERS):
        base = l * PER_LAYER_ROWS
        w_node = p_ref[base + L_WNODE:base + L_WNODE + H, 0:5 * H]       # [16,80]
        wc = p_ref[base + L_WC:base + L_WC + H, 0:H]                     # [16,16]
        wf1 = p_ref[base + L_WF1:base + L_WF1 + H, 0:2 * H]              # [16,32]
        wf2 = p_ref[base + L_WF2:base + L_WF2 + 2 * H, 0:H]              # [32,16]
        vec = p_ref[base + L_VEC:base + L_VEC + 8, :]                    # [8,128] single tile
        b_node = vec[0:1, 0:5 * H]
        bc = vec[1:2, 0:H]
        bne_s = vec[2:3, 0:H]
        bne_b = vec[3:4, 0:H]
        bf1 = vec[4:5, 0:2 * H]
        bf2 = vec[5:6, 0:H]
        bn2_s = vec[6:7, 0:H]
        bn2_b = vec[7:8, 0:H]

        # fused GEMM for the four node linears; lane order A | D | 0 | E | s_x*B
        nd = jnp.dot(x, w_node, preferred_element_type=f32) + b_node     # [16,80]
        Ax_bn = nd[:, 0:H]            # bn_node_x scale+shift already folded
        top = nd[:, H:3 * H]          # [ Dx | 0 ]      (zero block from zero weight cols)
        bot = nd[:, 3 * H:5 * H]      # [ Ex | s_x*Bx ]

        Ce = jnp.dot(e, wc, preferred_element_type=f32) + bc             # [32,16]

        # fused gather: [src|dst] @ [[Dx,0],[Ex,Bx_s]]
        #   msg[:,0:H]  = Dx[row] + Ex[col]      msg[:,H:2H] = s_x * Bx[col]
        stacked = jnp.concatenate([top, bot], axis=0)                    # [32,32]
        msg = jnp.dot(inc, stacked, preferred_element_type=f32)          # [32,32]

        e_ij = msg[:, 0:H] + Ce                                          # pre-BN; feeds the gate
        gated = jax.nn.sigmoid(e_ij) * msg[:, H:2 * H]                   # [32,16] (s_x-scaled)
        aggr_s = jnp.dot(srcT, gated, preferred_element_type=f32)        # [16,16] = s_x * aggr

        # node branch: BN folded => Ax_bn + aggr_s == BN(Ax + aggr); ReLU; dropout = identity
        x_trans = jnp.maximum(Ax_bn + aggr_s, 0.0)
        # edge branch: explicit BN affine (cannot fold: e_ij also feeds the gate)
        e_trans = jnp.maximum(e_ij * bne_s + bne_b, 0.0)

        # residual (in_dim == out_dim -> identity projection)
        x = x + x_trans
        e = e + e_trans

        # FFN block: x = norm2( x + FF(norm1(x)) ); norm1 folded into wf1/bf1
        h = jnp.maximum(jnp.dot(x, wf1, preferred_element_type=f32) + bf1, 0.0)
        h = jnp.dot(h, wf2, preferred_element_type=f32) + bf2
        x = (x + h) * bn2_s + bn2_b

    # --- global mean pool + head (lane-dense [G,128] store; cols 6: are zero) ---
    hw = p_ref[GBASE + G_HW:GBASE + G_HW + H, :]                         # [16,128]
    graph_x = jnp.dot(pool, x, preferred_element_type=f32)               # [G,16]
    out_ref[...] = jnp.dot(graph_x, hw, preferred_element_type=f32) + hb


def run_model(data_blocks, param_slab):
    """data_blocks: [B, 104, 32] f32, param_slab: [264, 128] f32 -> logits [B*G, 6]."""
    blocks = data_blocks.shape[0]
    out = pl.pallas_call(
        gated_gcn_kernel,
        out_shape=jax.ShapeDtypeStruct((blocks, GRAPHS_PER_BLOCK, OUT_LANES), jnp.float32),
        grid=(blocks,),
        in_specs=[
            pl.BlockSpec((None, DATA_ROWS, DATA_COLS), lambda b: (b, 0, 0)),
            pl.BlockSpec((TOTAL_PARAM_ROWS, SLAB_COLS), lambda b: (0, 0)),   # constant: no re-DMA
        ],
        out_specs=pl.BlockSpec((None, GRAPHS_PER_BLOCK, OUT_LANES), lambda b: (b, 0, 0)),
        compiler_params=pltpu.CompilerParams(dimension_semantics=("parallel",)),
    )(data_blocks, param_slab)
    return out.reshape(blocks * GRAPHS_PER_BLOCK, OUT_LANES)[:, :NUM_CLASSES]


# ---------------- parameter init + packing (glue code, plain JAX) ----------------

def _linear(key, fan_in, fan_out):
    """PyTorch-style uniform init; weight stored as [in, out], bias as [1, out]."""
    bound = 1.0 / (fan_in ** 0.5)
    kw, kb = jax.random.split(key)
    w = jax.random.uniform(kw, (fan_in, fan_out), jnp.float32, -bound, bound)
    b = jax.random.uniform(kb, (1, fan_out), jnp.float32, -bound, bound)
    return w, b


def init_params(key):
    keys = jax.random.split(key, 2 + LAYERS * 7 + 1)
    ki = iter(range(len(keys)))

    emb = jax.random.normal(keys[next(ki)], (2, NODE_EMB_DIM), jnp.float32)
    eew, eeb = _linear(keys[next(ki)], 7, EDGE_EMB_DIM)

    lw, lb, f1w, f1b, f2w, f2b = [], [], [], [], [], []
    for _ in range(LAYERS):
        ws, bs = [], []
        for _ in range(5):  # A, B, C, D, E
            w, b = _linear(keys[next(ki)], HIDDEN, HIDDEN)
            ws.append(w)
            bs.append(b)
        lw.append(jnp.stack(ws))
        lb.append(jnp.stack(bs))
        w1, b1 = _linear(keys[next(ki)], HIDDEN, 2 * HIDDEN)
        w2, b2 = _linear(keys[next(ki)], 2 * HIDDEN, HIDDEN)
        f1w.append(w1); f1b.append(b1); f2w.append(w2); f2b.append(b2)

    hw, hb = _linear(keys[next(ki)], HIDDEN, NUM_CLASSES)

    # BatchNorm params [L, 4 bn-types (x, e, norm1_ffn, norm2_ffn), 4 (gamma,beta,mean,var), H]
    bn = jnp.zeros((LAYERS, 4, 4, HIDDEN), jnp.float32)
    bn = bn.at[:, :, 0, :].set(1.0)   # gamma
    bn = bn.at[:, :, 3, :].set(1.0)   # running_var

    return {
        "emb": emb, "eew": eew, "eeb": eeb,
        "lw": jnp.stack(lw), "lb": jnp.stack(lb), "bn": bn,
        "f1w": jnp.stack(f1w), "f1b": jnp.stack(f1b),
        "f2w": jnp.stack(f2w), "f2b": jnp.stack(f2b),
        "hw": hw, "hb": hb,
    }


def pack_params(p):
    """Fold eval-mode BatchNorm into linears (where legal) and pack everything into ONE slab."""
    H = HIDDEN

    def fold_bn(b4):                   # b4: [4, H] = (gamma, beta, running_mean, running_var)
        g, beta, m, v = b4[0], b4[1], b4[2], b4[3]
        s = g * jax.lax.rsqrt(v + BN_EPS)
        return s[None, :], (beta - m * s)[None, :]

    def place(slab, r, arr):
        rr, cc = arr.shape
        return slab.at[r:r + rr, :cc].set(arr)

    slab = jnp.zeros((TOTAL_PARAM_ROWS, SLAB_COLS), jnp.float32)

    for l in range(LAYERS):
        base = l * PER_LAYER_ROWS
        sx, shx = fold_bn(p["bn"][l, 0])   # bn_node_x  (folded into A, B)
        se, she = fold_bn(p["bn"][l, 1])   # bn_edge_e  (explicit in-kernel)
        s1, sh1 = fold_bn(p["bn"][l, 2])   # norm1_ffn  (folded into ff_linear1)
        s2, sh2 = fold_bn(p["bn"][l, 3])   # norm2_ffn  (explicit in-kernel)

        wa, ba = p["lw"][l, 0], p["lb"][l, 0]
        wb, bb = p["lw"][l, 1], p["lb"][l, 1]
        wc, bc = p["lw"][l, 2], p["lb"][l, 2]
        wd, bd = p["lw"][l, 3], p["lb"][l, 3]
        wE, bE = p["lw"][l, 4], p["lb"][l, 4]

        zW = jnp.zeros((H, H), jnp.float32)
        zB = jnp.zeros((1, H), jnp.float32)
        # fused node weight, lane order A | D | 0 | E | s_x*B (zero block fuels the gather trick)
        w_node = jnp.concatenate([wa * sx, wd, zW, wE, wb * sx], axis=1)           # [16,80]
        b_node = jnp.concatenate([ba * sx + shx, bd, zB, bE, bb * sx], axis=1)     # [1,80]

        w1 = p["f1w"][l]
        wf1 = w1 * s1.T                             # fold norm1_ffn scale into input rows
        bf1 = sh1 @ w1 + p["f1b"][l]                # fold norm1_ffn shift

        slab = place(slab, base + L_WNODE, w_node)
        slab = place(slab, base + L_WC, wc)
        slab = place(slab, base + L_WF1, wf1)
        slab = place(slab, base + L_WF2, p["f2w"][l])
        vb = base + L_VEC
        slab = place(slab, vb + 0, b_node)
        slab = place(slab, vb + 1, bc)
        slab = place(slab, vb + 2, se)
        slab = place(slab, vb + 3, she)
        slab = place(slab, vb + 4, bf1)
        slab = place(slab, vb + 5, p["f2b"][l])
        slab = place(slab, vb + 6, s2)
        slab = place(slab, vb + 7, sh2)

    # global block: encoders zero-padded to DATA_COLS input rows; head padded to 128 lanes
    w_nenc = jnp.zeros((DATA_COLS, H), jnp.float32).at[0:2, :].set(p["emb"])
    w_eenc = jnp.zeros((DATA_COLS, H), jnp.float32).at[0:7, :].set(p["eew"])
    hw_pad = jnp.zeros((H, OUT_LANES), jnp.float32).at[:, 0:NUM_CLASSES].set(p["hw"])
    hb_pad = jnp.zeros((1, OUT_LANES), jnp.float32).at[:, 0:NUM_CLASSES].set(p["hb"])

    slab = place(slab, GBASE + G_NENC, w_nenc)
    slab = place(slab, GBASE + G_EENC, w_eenc)
    slab = place(slab, GBASE + G_HW, hw_pad)
    slab = place(slab, GBASE + G_VEC + 0, p["eeb"])
    slab = place(slab, GBASE + G_VEC + 1, hb_pad)
    return slab


# ---------------- per-block graph-data packing (glue code, plain JAX) ----------------

def build_block_slab(node_labels, row, col, edge_attr, batch_local):
    node_oh = jax.nn.one_hot(node_labels, 2, dtype=jnp.float32)                  # [N,2]
    src_oh = jax.nn.one_hot(row, N_NODES, dtype=jnp.float32)                     # [E,N]
    dst_oh = jax.nn.one_hot(col, N_NODES, dtype=jnp.float32)                     # [E,N]
    inc = jnp.concatenate([src_oh, dst_oh], axis=1)                              # [E,2N]
    srcT = src_oh.T                                                              # [N,E]
    batch_oh = jax.nn.one_hot(batch_local, GRAPHS_PER_BLOCK, dtype=jnp.float32).T  # [G,N]
    counts = jnp.maximum(batch_oh.sum(axis=1, keepdims=True), 1.0)
    pool = batch_oh / counts                                                     # [G,N]

    slab = jnp.zeros((DATA_ROWS, DATA_COLS), jnp.float32)
    slab = slab.at[D_NODE:D_NODE + N_NODES, 0:2].set(node_oh)
    slab = slab.at[D_EATTR:D_EATTR + N_EDGES, 0:7].set(edge_attr)
    slab = slab.at[D_POOL:D_POOL + GRAPHS_PER_BLOCK, 0:N_NODES].set(pool)
    slab = slab.at[D_INC:D_INC + N_EDGES, 0:2 * N_NODES].set(inc)
    slab = slab.at[D_SRCT:D_SRCT + N_NODES, 0:N_EDGES].set(srcT)
    return slab


if __name__ == "__main__":
    key = jax.random.PRNGKey(0)
    kp, kd = jax.random.split(key)

    params = init_params(kp)
    pslab = pack_params(params)

    nodes_per_graph = N_NODES // GRAPHS_PER_BLOCK
    edges_per_graph = N_EDGES // GRAPHS_PER_BLOCK
    batch_local = jnp.repeat(jnp.arange(GRAPHS_PER_BLOCK), nodes_per_graph)

    block_slabs = []
    for _ in range(NUM_BLOCKS):
        kd, kn, ka = jax.random.split(kd, 3)
        labels = jax.random.randint(kn, (N_NODES,), 0, 2)                # data.x in {0,1}
        edge_attr = jax.random.normal(ka, (N_EDGES, 7), jnp.float32)     # data.edge_attr
        rows, cols = [], []
        for g in range(GRAPHS_PER_BLOCK):                                # edges stay within graph
            kd, kr, kc = jax.random.split(kd, 3)
            lo = g * nodes_per_graph
            rows.append(jax.random.randint(kr, (edges_per_graph,), lo, lo + nodes_per_graph))
            cols.append(jax.random.randint(kc, (edges_per_graph,), lo, lo + nodes_per_graph))
        row = jnp.concatenate(rows)                                      # edge_index[0]
        col = jnp.concatenate(cols)                                      # edge_index[1]
        block_slabs.append(build_block_slab(labels, row, col, edge_attr, batch_local))
    data_blocks = jnp.stack(block_slabs)                                 # [B, 104, 32]

    logits = run_model(data_blocks, pslab)
    logits = jax.block_until_ready(logits)
    assert logits.shape == (NUM_BLOCKS * GRAPHS_PER_BLOCK, NUM_CLASSES)
    assert logits.dtype == jnp.float32
    print("KERNEL_OK")
</pallas_src>

<mosaic_0001>
module attributes {stable_mosaic.version = 11 : i64} {
  func.func @gated_gcn_kernel(%arg0: i32, %arg1: memref<1x104x32xf32, #tpu.memory_space<vmem>>, %arg2: memref<264x128xf32, #tpu.memory_space<vmem>>, %arg3: memref<1x2x128xf32, #tpu.memory_space<vmem>>) attributes {dimension_semantics = [#tpu.dimension_semantics<parallel>], iteration_bounds = array<i64: 4>, scalar_prefetch = 0 : i64, scratch_operands = 0 : i64, tpu.core_type = #tpu.core_type<tc>, window_params = [{transform_indices = @transform_0, window_bounds = array<i64: 1, 104, 32>}, {pipeline_mode = #tpu.pipeline_mode<synchronous>, transform_indices = @transform_1, window_bounds = array<i64: 264, 128>}, {transform_indices = @transform_2, window_bounds = array<i64: 1, 2, 128>}]} {
    %c0 = arith.constant 0 : index
    %c0_0 = arith.constant 0 : index
    %c0_1 = arith.constant 0 : index
    %0 = vector.load %arg1[%c0, %c0_0, %c0_1] : memref<1x104x32xf32, #tpu.memory_space<vmem>>, vector<1x16x32xf32>
    %1 = vector.shape_cast %0 : vector<1x16x32xf32> to vector<16x32xf32>
    %c0_2 = arith.constant 0 : index
    %c16 = arith.constant 16 : index
    %c0_3 = arith.constant 0 : index
    %2 = vector.load %arg1[%c0_2, %c16, %c0_3] : memref<1x104x32xf32, #tpu.memory_space<vmem>>, vector<1x32x32xf32>
    %3 = vector.shape_cast %2 : vector<1x32x32xf32> to vector<32x32xf32>
    %c0_4 = arith.constant 0 : index
    %c48 = arith.constant 48 : index
    %c0_5 = arith.constant 0 : index
    %4 = vector.load %arg1[%c0_4, %c48, %c0_5] : memref<1x104x32xf32, #tpu.memory_space<vmem>>, vector<1x2x16xf32>
    %5 = vector.shape_cast %4 : vector<1x2x16xf32> to vector<2x16xf32>
    %c0_6 = arith.constant 0 : index
    %c56 = arith.constant 56 : index
    %c0_7 = arith.constant 0 : index
    %6 = vector.load %arg1[%c0_6, %c56, %c0_7] : memref<1x104x32xf32, #tpu.memory_space<vmem>>, vector<1x32x32xf32>
    %7 = vector.shape_cast %6 : vector<1x32x32xf32> to vector<32x32xf32>
    %c0_8 = arith.constant 0 : index
    %c88 = arith.constant 88 : index
    %c0_9 = arith.constant 0 : index
    %8 = vector.load %arg1[%c0_8, %c88, %c0_9] : memref<1x104x32xf32, #tpu.memory_space<vmem>>, vector<1x16x32xf32>
    %9 = vector.shape_cast %8 : vector<1x16x32xf32> to vector<16x32xf32>
    %c176 = arith.constant 176 : index
    %c0_10 = arith.constant 0 : index
    %10 = vector.load %arg2[%c176, %c0_10] : memref<264x128xf32, #tpu.memory_space<vmem>>, vector<32x16xf32>
    %c208 = arith.constant 208 : index
    %c0_11 = arith.constant 0 : index
    %11 = vector.load %arg2[%c208, %c0_11] : memref<264x128xf32, #tpu.memory_space<vmem>>, vector<32x16xf32>
    %c256 = arith.constant 256 : index
    %c0_12 = arith.constant 0 : index
    %12 = vector.load %arg2[%c256, %c0_12] : memref<264x128xf32, #tpu.memory_space<vmem>>, vector<8x128xf32>
    %13 = vector.extract_strided_slice %12 {offsets = [0, 0], sizes = [1, 16], strides = [1, 1]} : vector<8x128xf32> to vector<1x16xf32>
    %14 = vector.extract_strided_slice %12 {offsets = [1, 0], sizes = [1, 128], strides = [1, 1]} : vector<8x128xf32> to vector<1x128xf32>
    %cst = arith.constant dense<0.000000e+00> : vector<16x16xf32>
    %15 = tpu.matmul %1, %10, %cst {dimension_numbers = #tpu.dot_dimension_numbers<[1], [0], [0], [1], [0, 0, 1, 1], [], []>} : vector<16x32xf32>, vector<32x16xf32>, vector<16x16xf32> -> vector<16x16xf32>
    %cst_13 = arith.constant dense<0.000000e+00> : vector<32x16xf32>
    %16 = tpu.matmul %3, %11, %cst_13 {dimension_numbers = #tpu.dot_dimension_numbers<[1], [0], [0], [1], [0, 0, 1, 1], [], []>} : vector<32x32xf32>, vector<32x16xf32>, vector<32x16xf32> -> vector<32x16xf32>
    %17 = vector.broadcast %13 : vector<1x16xf32> to vector<32x16xf32>
    %18 = arith.addf %16, %17 : vector<32x16xf32>
    %c0_14 = arith.constant 0 : index
    %c0_15 = arith.constant 0 : index
    %19 = vector.load %arg2[%c0_14, %c0_15] : memref<264x128xf32, #tpu.memory_space<vmem>>, vector<16x80xf32>
    %c16_16 = arith.constant 16 : index
    %c0_17 = arith.constant 0 : index
    %20 = vector.load %arg2[%c16_16, %c0_17] : memref<264x128xf32, #tpu.memory_space<vmem>>, vector<16x16xf32>
    %c32 = arith.constant 32 : index
    %c0_18 = arith.constant 0 : index
    %21 = vector.load %arg2[%c32, %c0_18] : memref<264x128xf32, #tpu.memory_space<vmem>>, vector<16x32xf32>
    %c48_19 = arith.constant 48 : index
    %c0_20 = arith.constant 0 : index
    %22 = vector.load %arg2[%c48_19, %c0_20] : memref<264x128xf32, #tpu.memory_space<vmem>>, vector<32x16xf32>
    %c80 = arith.constant 80 : index
    %c0_21 = arith.constant 0 : index
    %23 = vector.load %arg2[%c80, %c0_21] : memref<264x128xf32, #tpu.memory_space<vmem>>, vector<8x128xf32>
    %24 = vector.extract_strided_slice %23 {offsets = [0, 0], sizes = [1, 80], strides = [1, 1]} : vector<8x128xf32> to vector<1x80xf32>
    %25 = vector.extract_strided_slice %23 {offsets = [1, 0], sizes = [1, 16], strides = [1, 1]} : vector<8x128xf32> to vector<1x16xf32>
    %26 = vector.extract_strided_slice %23 {offsets = [2, 0], sizes = [1, 16], strides = [1, 1]} : vector<8x128xf32> to vector<1x16xf32>
    %27 = vector.extract_strided_slice %23 {offsets = [3, 0], sizes = [1, 16], strides = [1, 1]} : vector<8x128xf32> to vector<1x16xf32>
    %28 = vector.extract_strided_slice %23 {offsets = [4, 0], sizes = [1, 32], strides = [1, 1]} : vector<8x128xf32> to vector<1x32xf32>
    %29 = vector.extract_strided_slice %23 {offsets = [5, 0], sizes = [1, 16], strides = [1, 1]} : vector<8x128xf32> to vector<1x16xf32>
    %30 = vector.extract_strided_slice %23 {offsets = [6, 0], sizes = [1, 16], strides = [1, 1]} : vector<8x128xf32> to vector<1x16xf32>
    %31 = vector.extract_strided_slice %23 {offsets = [7, 0], sizes = [1, 16], strides = [1, 1]} : vector<8x128xf32> to vector<1x16xf32>
    %cst_22 = arith.constant dense<0.000000e+00> : vector<16x80xf32>
    %32 = tpu.matmul %15, %19, %cst_22 {dimension_numbers = #tpu.dot_dimension_numbers<[1], [0], [0], [1], [0, 0, 1, 1], [], []>} : vector<16x16xf32>, vector<16x80xf32>, vector<16x80xf32> -> vector<16x80xf32>
    %33 = vector.broadcast %24 : vector<1x80xf32> to vector<16x80xf32>
    %34 = arith.addf %32, %33 : vector<16x80xf32>
    %35 = vector.extract_strided_slice %34 {offsets = [0, 0], sizes = [16, 16], strides = [1, 1]} : vector<16x80xf32> to vector<16x16xf32>
    %36 = vector.extract_strided_slice %34 {offsets = [0, 16], sizes = [16, 32], strides = [1, 1]} : vector<16x80xf32> to vector<16x32xf32>
    %37 = vector.extract_strided_slice %34 {offsets = [0, 48], sizes = [16, 32], strides = [1, 1]} : vector<16x80xf32> to vector<16x32xf32>
    %cst_23 = arith.constant dense<0.000000e+00> : vector<32x16xf32>
    %38 = tpu.matmul %18, %20, %cst_23 {dimension_numbers = #tpu.dot_dimension_numbers<[1], [0], [0], [1], [0, 0, 1, 1], [], []>} : vector<32x16xf32>, vector<16x16xf32>, vector<32x16xf32> -> vector<32x16xf32>
    %39 = vector.broadcast %25 : vector<1x16xf32> to vector<32x16xf32>
    %40 = arith.addf %38, %39 : vector<32x16xf32>
    %41 = tpu.concatenate %36, %37 in 0 : vector<16x32xf32>, vector<16x32xf32> -> vector<32x32xf32>
    %cst_24 = arith.constant dense<0.000000e+00> : vector<32x32xf32>
    %42 = tpu.matmul %7, %41, %cst_24 {dimension_numbers = #tpu.dot_dimension_numbers<[1], [0], [0], [1], [0, 0, 1, 1], [], []>} : vector<32x32xf32>, vector<32x32xf32>, vector<32x32xf32> -> vector<32x32xf32>
    %43 = vector.extract_strided_slice %42 {offsets = [0, 0], sizes = [32, 16], strides = [1, 1]} : vector<32x32xf32> to vector<32x16xf32>
    %44 = arith.addf %43, %40 : vector<32x16xf32>
    %45 = arith.negf %44 : vector<32x16xf32>
    %46 = math.exp %45 : vector<32x16xf32>
    %cst_25 = arith.constant 1.000000e+00 : f32
    %47 = vector.broadcast %cst_25 : f32 to vector<32x16xf32>
    %48 = arith.addf %47, %46 : vector<32x16xf32>
    %49 = arith.divf %47, %48 : vector<32x16xf32>
    %50 = vector.extract_strided_slice %42 {offsets = [0, 16], sizes = [32, 16], strides = [1, 1]} : vector<32x32xf32> to vector<32x16xf32>
    %51 = arith.mulf %49, %50 : vector<32x16xf32>
    %cst_26 = arith.constant dense<0.000000e+00> : vector<16x16xf32>
    %52 = tpu.matmul %9, %51, %cst_26 {dimension_numbers = #tpu.dot_dimension_numbers<[1], [0], [0], [1], [0, 0, 1, 1], [], []>} : vector<16x32xf32>, vector<32x16xf32>, vector<16x16xf32> -> vector<16x16xf32>
    %53 = arith.addf %35, %52 : vector<16x16xf32>
    %cst_27 = arith.constant 0.000000e+00 : f32
    %54 = vector.broadcast %cst_27 : f32 to vector<16x16xf32>
    %55 = arith.maximumf %53, %54 : vector<16x16xf32>
    %56 = vector.broadcast %26 : vector<1x16xf32> to vector<32x16xf32>
    %57 = arith.mulf %44, %56 : vector<32x16xf32>
    %58 = vector.broadcast %27 : vector<1x16xf32> to vector<32x16xf32>
    %59 = arith.addf %57, %58 : vector<32x16xf32>
    %cst_28 = arith.constant 0.000000e+00 : f32
    %60 = vector.broadcast %cst_28 : f32 to vector<32x16xf32>
    %61 = arith.maximumf %59, %60 : vector<32x16xf32>
    %62 = arith.addf %15, %55 : vector<16x16xf32>
    %63 = arith.addf %18, %61 : vector<32x16xf32>
    %cst_29 = arith.constant dense<0.000000e+00> : vector<16x32xf32>
    %64 = tpu.matmul %62, %21, %cst_29 {dimension_numbers = #tpu.dot_dimension_numbers<[1], [0], [0], [1], [0, 0, 1, 1], [], []>} : vector<16x16xf32>, vector<16x32xf32>, vector<16x32xf32> -> vector<16x32xf32>
    %65 = vector.broadcast %28 : vector<1x32xf32> to vector<16x32xf32>
    %66 = arith.addf %64, %65 : vector<16x32xf32>
    %cst_30 = arith.constant 0.000000e+00 : f32
    %67 = vector.broadcast %cst_30 : f32 to vector<16x32xf32>
    %68 = arith.maximumf %66, %67 : vector<16x32xf32>
    %cst_31 = arith.constant dense<0.000000e+00> : vector<16x16xf32>
    %69 = tpu.matmul %68, %22, %cst_31 {dimension_numbers = #tpu.dot_dimension_numbers<[1], [0], [0], [1], [0, 0, 1, 1], [], []>} : vector<16x32xf32>, vector<32x16xf32>, vector<16x16xf32> -> vector<16x16xf32>
    %70 = vector.broadcast %29 : vector<1x16xf32> to vector<16x16xf32>
    %71 = arith.addf %69, %70 : vector<16x16xf32>
    %72 = arith.addf %62, %71 : vector<16x16xf32>
    %73 = vector.broadcast %30 : vector<1x16xf32> to vector<16x16xf32>
    %74 = arith.mulf %72, %73 : vector<16x16xf32>
    %75 = vector.broadcast %31 : vector<1x16xf32> to vector<16x16xf32>
    %76 = arith.addf %74, %75 : vector<16x16xf32>
    %c88_32 = arith.constant 88 : index
    %c0_33 = arith.constant 0 : index
    %77 = vector.load %arg2[%c88_32, %c0_33] : memref<264x128xf32, #tpu.memory_space<vmem>>, vector<16x80xf32>
    %c104 = arith.constant 104 : index
    %c0_34 = arith.constant 0 : index
    %78 = vector.load %arg2[%c104, %c0_34] : memref<264x128xf32, #tpu.memory_space<vmem>>, vector<16x16xf32>
    %c120 = arith.constant 120 : index
    %c0_35 = arith.constant 0 : index
    %79 = vector.load %arg2[%c120, %c0_35] : memref<264x128xf32, #tpu.memory_space<vmem>>, vector<16x32xf32>
    %c136 = arith.constant 136 : index
    %c0_36 = arith.constant 0 : index
    %80 = vector.load %arg2[%c136, %c0_36] : memref<264x128xf32, #tpu.memory_space<vmem>>, vector<32x16xf32>
    %c168 = arith.constant 168 : index
    %c0_37 = arith.constant 0 : index
    %81 = vector.load %arg2[%c168, %c0_37] : memref<264x128xf32, #tpu.memory_space<vmem>>, vector<8x128xf32>
    %82 = vector.extract_strided_slice %81 {offsets = [0, 0], sizes = [1, 80], strides = [1, 1]} : vector<8x128xf32> to vector<1x80xf32>
    %83 = vector.extract_strided_slice %81 {offsets = [1, 0], sizes = [1, 16], strides = [1, 1]} : vector<8x128xf32> to vector<1x16xf32>
    %84 = vector.extract_strided_slice %81 {offsets = [4, 0], sizes = [1, 32], strides = [1, 1]} : vector<8x128xf32> to vector<1x32xf32>
    %85 = vector.extract_strided_slice %81 {offsets = [5, 0], sizes = [1, 16], strides = [1, 1]} : vector<8x128xf32> to vector<1x16xf32>
    %86 = vector.extract_strided_slice %81 {offsets = [6, 0], sizes = [1, 16], strides = [1, 1]} : vector<8x128xf32> to vector<1x16xf32>
    %87 = vector.extract_strided_slice %81 {offsets = [7, 0], sizes = [1, 16], strides = [1, 1]} : vector<8x128xf32> to vector<1x16xf32>
    %cst_38 = arith.constant dense<0.000000e+00> : vector<16x80xf32>
    %88 = tpu.matmul %76, %77, %cst_38 {dimension_numbers = #tpu.dot_dimension_numbers<[1], [0], [0], [1], [0, 0, 1, 1], [], []>} : vector<16x16xf32>, vector<16x80xf32>, vector<16x80xf32> -> vector<16x80xf32>
    %89 = vector.broadcast %82 : vector<1x80xf32> to vector<16x80xf32>
    %90 = arith.addf %88, %89 : vector<16x80xf32>
    %91 = vector.extract_strided_slice %90 {offsets = [0, 0], sizes = [16, 16], strides = [1, 1]} : vector<16x80xf32> to vector<16x16xf32>
    %92 = vector.extract_strided_slice %90 {offsets = [0, 16], sizes = [16, 32], strides = [1, 1]} : vector<16x80xf32> to vector<16x32xf32>
    %93 = vector.extract_strided_slice %90 {offsets = [0, 48], sizes = [16, 32], strides = [1, 1]} : vector<16x80xf32> to vector<16x32xf32>
    %cst_39 = arith.constant dense<0.000000e+00> : vector<32x16xf32>
    %94 = tpu.matmul %63, %78, %cst_39 {dimension_numbers = #tpu.dot_dimension_numbers<[1], [0], [0], [1], [0, 0, 1, 1], [], []>} : vector<32x16xf32>, vector<16x16xf32>, vector<32x16xf32> -> vector<32x16xf32>
    %95 = vector.broadcast %83 : vector<1x16xf32> to vector<32x16xf32>
    %96 = arith.addf %94, %95 : vector<32x16xf32>
    %97 = tpu.concatenate %92, %93 in 0 : vector<16x32xf32>, vector<16x32xf32> -> vector<32x32xf32>
    %cst_40 = arith.constant dense<0.000000e+00> : vector<32x32xf32>
    %98 = tpu.matmul %7, %97, %cst_40 {dimension_numbers = #tpu.dot_dimension_numbers<[1], [0], [0], [1], [0, 0, 1, 1], [], []>} : vector<32x32xf32>, vector<32x32xf32>, vector<32x32xf32> -> vector<32x32xf32>
    %99 = vector.extract_strided_slice %98 {offsets = [0, 0], sizes = [32, 16], strides = [1, 1]} : vector<32x32xf32> to vector<32x16xf32>
    %100 = arith.addf %99, %96 : vector<32x16xf32>
    %101 = arith.negf %100 : vector<32x16xf32>
    %102 = math.exp %101 : vector<32x16xf32>
    %cst_41 = arith.constant 1.000000e+00 : f32
    %103 = vector.broadcast %cst_41 : f32 to vector<32x16xf32>
    %104 = arith.addf %103, %102 : vector<32x16xf32>
    %105 = arith.divf %103, %104 : vector<32x16xf32>
    %106 = vector.extract_strided_slice %98 {offsets = [0, 16], sizes = [32, 16], strides = [1, 1]} : vector<32x32xf32> to vector<32x16xf32>
    %107 = arith.mulf %105, %106 : vector<32x16xf32>
    %cst_42 = arith.constant dense<0.000000e+00> : vector<16x16xf32>
    %108 = tpu.matmul %9, %107, %cst_42 {dimension_numbers = #tpu.dot_dimension_numbers<[1], [0], [0], [1], [0, 0, 1, 1], [], []>} : vector<16x32xf32>, vector<32x16xf32>, vector<16x16xf32> -> vector<16x16xf32>
    %109 = arith.addf %91, %108 : vector<16x16xf32>
    %cst_43 = arith.constant 0.000000e+00 : f32
    %110 = vector.broadcast %cst_43 : f32 to vector<16x16xf32>
    %111 = arith.maximumf %109, %110 : vector<16x16xf32>
    %112 = arith.addf %76, %111 : vector<16x16xf32>
    %cst_44 = arith.constant dense<0.000000e+00> : vector<16x32xf32>
    %113 = tpu.matmul %112, %79, %cst_44 {dimension_numbers = #tpu.dot_dimension_numbers<[1], [0], [0], [1], [0, 0, 1, 1], [], []>} : vector<16x16xf32>, vector<16x32xf32>, vector<16x32xf32> -> vector<16x32xf32>
    %114 = vector.broadcast %84 : vector<1x32xf32> to vector<16x32xf32>
    %115 = arith.addf %113, %114 : vector<16x32xf32>
    %cst_45 = arith.constant 0.000000e+00 : f32
    %116 = vector.broadcast %cst_45 : f32 to vector<16x32xf32>
    %117 = arith.maximumf %115, %116 : vector<16x32xf32>
    %cst_46 = arith.constant dense<0.000000e+00> : vector<16x16xf32>
    %118 = tpu.matmul %117, %80, %cst_46 {dimension_numbers = #tpu.dot_dimension_numbers<[1], [0], [0], [1], [0, 0, 1, 1], [], []>} : vector<16x32xf32>, vector<32x16xf32>, vector<16x16xf32> -> vector<16x16xf32>
    %119 = vector.broadcast %85 : vector<1x16xf32> to vector<16x16xf32>
    %120 = arith.addf %118, %119 : vector<16x16xf32>
    %121 = arith.addf %112, %120 : vector<16x16xf32>
    %122 = vector.broadcast %86 : vector<1x16xf32> to vector<16x16xf32>
    %123 = arith.mulf %121, %122 : vector<16x16xf32>
    %124 = vector.broadcast %87 : vector<1x16xf32> to vector<16x16xf32>
    %125 = arith.addf %123, %124 : vector<16x16xf32>
    %c240 = arith.constant 240 : index
    %c0_47 = arith.constant 0 : index
    %126 = vector.load %arg2[%c240, %c0_47] : memref<264x128xf32, #tpu.memory_space<vmem>>, vector<16x128xf32>
    %cst_48 = arith.constant dense<0.000000e+00> : vector<2x16xf32>
    %127 = tpu.matmul %5, %125, %cst_48 {dimension_numbers = #tpu.dot_dimension_numbers<[1], [0], [0], [1], [0, 0, 1, 1], [], []>} : vector<2x16xf32>, vector<16x16xf32>, vector<2x16xf32> -> vector<2x16xf32>
    %cst_49 = arith.constant dense<0.000000e+00> : vector<2x128xf32>
    %128 = tpu.matmul %127, %126, %cst_49 {dimension_numbers = #tpu.dot_dimension_numbers<[1], [0], [0], [1], [0, 0, 1, 1], [], []>} : vector<2x16xf32>, vector<16x128xf32>, vector<2x128xf32> -> vector<2x128xf32>
    %129 = vector.broadcast %14 : vector<1x128xf32> to vector<2x128xf32>
    %130 = arith.addf %128, %129 : vector<2x128xf32>
    %c0_50 = arith.constant 0 : index
    %c0_51 = arith.constant 0 : index
    %c0_52 = arith.constant 0 : index
    %131 = vector.load %arg3[%c0_50, %c0_51, %c0_52] : memref<1x2x128xf32, #tpu.memory_space<vmem>>, vector<1x2x128xf32>
    %132 = vector.shape_cast %131 : vector<1x2x128xf32> to vector<2x128xf32>
    %133 = vector.shape_cast %130 : vector<2x128xf32> to vector<1x2x128xf32>
    tpu.vector_store %arg3[%c0_50, %c0_51, %c0_52], %133 {strides = array<i32>} : memref<1x2x128xf32, #tpu.memory_space<vmem>>, vector<1x2x128xf32>,
    return
  }
  func.func @transform_0(%arg0: i32) -> (i32, i32, i32) {
    %c0_i32 = arith.constant 0 : i32
    %c0_i32_0 = arith.constant 0 : i32
    %c0_i32_1 = arith.constant 0 : i32
    return %arg0, %c0_i32, %c0_i32_0 : i32, i32, i32
  }
  func.func @transform_1(%arg0: i32) -> (i32, i32) {
    %c0_i32 = arith.constant 0 : i32
    %c0_i32_0 = arith.constant 0 : i32
    %c0_i32_1 = arith.constant 0 : i32
    return %c0_i32, %c0_i32_0 : i32, i32
  }
  func.func @transform_2(%arg0: i32) -> (i32, i32, i32) {
    %c0_i32 = arith.constant 0 : i32
    %c0_i32_0 = arith.constant 0 : i32
    %c0_i32_1 = arith.constant 0 : i32
    return %arg0, %c0_i32, %c0_i32_0 : i32, i32, i32
  }
}

</mosaic_0001>

<bundles_post_ra>
// kernel: tpu_custom_call.1
= control target key start
LH: loop header
LB: loop body
LE: loop exit
PB: predicated region body
PF: predicated region fallthrough
CT: control target
= control target key end

     0   :  { %7 = vsyncpa [#allocation3], 0  ;;  %s1707_s0 = inlined_call_operand.vmem [shape: f32[4,104,32], index: 0, kind: input, shape index: {}]   ;;  %s1708_s1 = inlined_call_operand.vmem [shape: f32[264,128], index: 1, kind: input, shape index: {}]   ;;  %s1709_s2 = inlined_call_operand.hbm [shape: f32[4,2,128], index: 2, kind: output, shape index: {}]  }
   0x1   :  { %9 = vsyncpa [#allocation3 + $0x1], 0  ;;  %s1299_s9 = smov 0   ;;  %s1301_s10 = smov 0  }
   0x2   :  { %s1303_s11 = smov 0   ;;  %s1305_s12 = smov 0  }
   0x3 LB: > { %s1320_s13 = sadd.s32 4294967295, %s1280_s12   ;;  %s1056_s14 = sadd.s32 4294967294, %s1280_s12   ;;  %s1280_s12 = sphi %s1305_s12, %s1727_s12   ;;  %s1276_s11 = sphi %s1303_s11, %s1726_s11   ;;  %s1272_s10 = sphi %s1301_s10, %s1725_s10   ;;  %s1268_s9 = sphi %s1299_s9, %s1724_s9  }
   0x4   : > { %s1324_s15 = sadd.s32 1, %s1280_s12   ;;  %s69_s16 = sadd.s32 1, %s1276_s11 }
   0x5   : > { %s66_s17 = ssub.s32 %s1280_s12, %s1324_s15  ;;  %p79_p0 = scmp.ne.s32.totalorder %s1276_s11, %s1272_s10 }
   0x6   : > { %p67_p1 = scmp.eq.s32.totalorder %s66_s17, 0  ;;  %p80_p2 = scmp.eq.s32.totalorder %s1320_s13, 3 }
   0x7   : > { %p85_p3 = scmp.ne.s32.totalorder %s1272_s10, %s1268_s9  ;;  %p86_p4 = scmp.eq.s32.totalorder %s1056_s14, 3 }
   0x8   : > { %s1335_s18 = scalar_select %p67_p1, %s1276_s11, %s69_s16  }
   0x9   : > { %p1337_p5 = por %p80_p2, %p79_p0  ;;  %p1341_p6 = por %p86_p4, %p85_p3 }
   0xa   : > { %p1059_p7 = scmp.ge.s32.totalorder %s1280_s12, 1  ;;  %p115_p8 = scmp.lt.s32.totalorder %s1280_s12, 5 }
   0xc   : > { %p116_p9 = pnand %p1059_p7, %p115_p8 }
   0xd   : > { %p137_p10 = scmp.lt.s32.totalorder (!%p116_p9), %s1320_s13, 3  ;;  %s1283_s30 = smov (!%p116_p9), 96  }
   0xe   : > { %119 = sbr.rel (%p116_p9) target bundleno = 2517 (0x9d5), region = 28  ;;  %s134_s23 = sand.u32 (!%p116_p9), 1, %s1272_s10  }
   0xf   : > { %s1060_s24 = sshll.u32 (!%p116_p9), %s134_s23, 1  ;;  %s982_s3 = scalar_lea.sflag (!%p116_p9), [#allocation3], %s134_s23 }
  0x10   : > { %s136_s26 = scalar_lea.vmem (!%p116_p9), [#allocation2], %s1060_s24  ;;  %s1238_s8 = scalar_lea.hbm (!%p116_p9), %s1709_s2, 8 }
  0x11   : > { %s994_s27 = sshll.u32 (!%p116_p9), %s136_s26, 4  ;;  %s995_s27 = int_to_ptr.vmem [resolvable:$true] %s994_s27 }
  0x13   : > { %v158_v0 = vld [vmem:[%s1708_s1 + $0xc8] sm:$0xff]  ;;  %v157_v1 = vld [vmem:[%s1708_s1 + $0xc0] sm:$0xff]  ;;  %v156_v3 = vld [vmem:[%s1708_s1 + $0xb8] sm:$0xff]  ;;  %s138_s29 = scalar_select %p137_p10, %s1320_s13, 3  ;;  %vm164_vm0 = vcmask 261120   ;;  %vm248_vm1 = vcmask 130048  }
  0x14   : > { %183 = vmatpush.msra.mxu0 %v158_v0  ;;  %v237_v2 = vld [vmem:[%s1708_s1 + $0x8] sm:$0xff]  ;;  %v155_v4 = vld [vmem:[%s1708_s1 + $0xb0] sm:$0xff]  ;;  %v236_v7 = vld [vmem:[%s1708_s1] sm:$0xff] }
  0x15   : > { %269 = vmatpush.msra.mxu2 %v237_v2  ;;  %s1114_s4 = smul.u32 104, %s138_s29  ;;  %v162_v10 = vld [vmem:[%s1708_s1 + $0xe8] sm:$0xff]  ;;  %v161_v11 = vld [vmem:[%s1708_s1 + $0xe0] sm:$0xff]  ;;  %v160_v12 = vld [vmem:[%s1708_s1 + $0xd8] sm:$0xff]  ;;  %s1282_s29 = smov 112  }
  0x16   : > { %184 = vmatpush.msra.mxu0 %v157_v1  ;;  %219 = vmatpush.msra.mxu1 %v162_v10  ;;  %v159_v13 = vld [vmem:[%s1708_s1 + $0xd0] sm:$0xff]  ;;  %v1422_v26 = vld [vmem:[%s1708_s1 + $0x100] sm:$0xff]  ;;  %v239_v28 = vld [vmem:[%s1708_s1 + $0x18] sm:$0xff] }
  0x17   : > { %s1367_s7 = scalar_lea.vmem %s1707_s0, %s1114_s4  ;;  %270 = vmatpush.msra.mxu2 %v236_v7  ;;  %v1401_v16 = vld [vmem:[%s1708_s1 + $0x50] sm:$0xff]  ;;  %v194_v29 = vperm.slane %v1422_v26, 0  ;;  %305 = vmatpush.msra.mxu3 %v239_v28  ;;  %v604_v49 = vld [vmem:[%s1708_s1 + $0x68] sm:$0xff] }
  0x18   : > { %185 = vmatpush.msra.mxu0 %v156_v3  ;;  %v142_v5 = vld [vmem:[%s1367_s7] sm:$0xff]  ;;  %v143_v6 = vld [vmem:[%s1367_s7 + $0x8] sm:$0xff]  ;;  %220 = vmatpush.msra.mxu1 %v161_v11  ;;  %v144_v14 = vld [vmem:[%s1367_s7 + $0x10] sm:$0xff]  ;;  %v247_v17 = vperm.slane %v1401_v16, 0  ;;  %v278_v51 = vperm.slane %v1401_v16, 1  ;;  %v512_v54 = vperm.slane %v1401_v16, 2 }
  0x19   : > { %v145_v22 = vld [vmem:[%s1367_s7 + $0x18] sm:$0xff]  ;;  %v146_v23 = vld [vmem:[%s1367_s7 + $0x20] sm:$0xff]  ;;  %v147_v24 = vld [vmem:[%s1367_s7 + $0x28] sm:$0xff]  ;;  %v517_v57 = vperm.slane %v1401_v16, 3 }
  0x1a   : > { %186 = vmatpush.msra.mxu0 %v155_v4  ;;  %221 = vmatpush.msra.mxu1 %v160_v12  ;;  %v238_v30 = vld [vmem:[%s1708_s1 + $0x10] sm:$0xff]  ;;  %v1442_v44 = vld [vmem:[%s1367_s7 + $0x38] sm:$0xff]  ;;  %v1447_v45 = vld [vmem:[%s1367_s7 + $0x40] sm:$0xff] }
  0x1b   : > { %1062 = vmatmul.msk.f32.vlgmr.msra.gmra.mxu0 %vm164_vm0, %v142_v5  ;;  %306 = vmatpush.msra.mxu3 %v238_v30  ;;  %v1452_v46 = vld [vmem:[%s1367_s7 + $0x48] sm:$0xff]  ;;  %v1457_v47 = vld [vmem:[%s1367_s7 + $0x50] sm:$0xff] }
  0x1c   : > { %222 = vmatpush.msra.mxu1 %v159_v13  ;;  %v605_v48 = vld [vmem:[%s1708_s1 + $0x70] sm:$0xff] }
  0x1d   : > { %1064 = vmatmul.msk.f32.vlgmr.msra.gmra.mxu1 %vm164_vm0, %v144_v14 }
  0x23   : > { %1063 = vmatmul.msk.f32.gmra.mxu0 %vm164_vm0, %v143_v6 }
  0x25   : > { %1065 = vmatmul.msk.f32.gmra.mxu1 %vm164_vm0, %v145_v22 }
  0x2d   : > { %1066 = vmatmul.msk.f32.gmra.mxu1 %vm164_vm0, %v146_v23 }
  0x35   : > { %1067 = vmatmul.msk.f32.gmra.mxu1 %vm164_vm0, %v147_v24 }
  0x98   : > { %v1376_v8 = vpop.f32.mrf.mxu0 }
  0x99   : > { %1068 = vmatmul.msk.f32.vlgmr.msra.gmra.mxu2 %vm248_vm1, %v1376_v8 }
  0x9a   : > { %v224_v27 = vpop.f32.mrf.mxu1 }
  0x9b   : > { %v225_v31 = vadd.f32 %v224_v27, %v194_v29 }
  0x9d   : > { %1070 = vmatmul.msk.f32.vlgmr.msra.gmra.mxu3 %vm248_vm1, %v225_v31 }
  0xa0   : > { %v1380_v9 = vpop.f32.mrf.mxu0 }
  0xa1   : > { %1069 = vmatmul.msk.f32.gmra.mxu2 %vm248_vm1, %v1380_v9 }
  0xa2   : > { %v227_v32 = vpop.f32.mrf.mxu1 }
  0xa3   : > { %v228_v33 = vadd.f32 %v227_v32, %v194_v29 }
  0xa5   : > { %1071 = vmatmul.msk.f32.gmra.mxu3 %vm248_vm1, %v228_v33 }
  0xaa   : > { %v230_v34 = vpop.f32.mrf.mxu1 }
  0xab   : > { %v1433_v35 = vadd.f32 %v230_v34, %v194_v29 }
  0xad   : > { %1072 = vmatmul.msk.f32.gmra.mxu3 %vm248_vm1, %v1433_v35 }
  0xb2   : > { %v233_v36 = vpop.f32.mrf.mxu1 }
  0xb3   : > { %v1437_v37 = vadd.f32 %v233_v36, %v194_v29 }
  0xb5   : > { %1073 = vmatmul.msk.f32.gmra.mxu3 %vm248_vm1, %v1437_v37 }
 0x11c   : > { %v272_v15 = vpop.f32.mrf.mxu2 }
 0x11d   : > { %v1404_v19 = vadd.f32 %v272_v15, %v247_v17 }
 0x120   : > { %v308_v50 = vpop.f32.mrf.mxu3 }
 0x121   : > { %v309_v52 = vadd.f32 %v308_v50, %v278_v51 }
 0x124   : > { %v275_v18 = vpop.f32.mrf.mxu2 }
 0x125   : > { %v1406_v20 = vadd.f32 %v275_v18, %v247_v17 }
 0x127   : > { %v1166_v21 = vpack.i.bf16 %v1404_v19, %v1406_v20 }
 0x128   : > { %v311_v53 = vpop.f32.mrf.mxu3 }
 0x129   : > { %1167 = vrot.lane.b32.xlu1 %v1166_v21, %s1282_s29  ;;  %1157 = vrot.lane.b32.xlu0 %v1166_v21, %s1283_s30  ;;  %v312_v60 = vadd.f32 %v311_v53, %v278_v51 }
 0x130   : > { %v314_v63 = vpop.f32.mrf.mxu3 }
 0x131   : > { %v315_v4 = vadd.f32 %v314_v63, %v278_v51 }
 0x138   : > { %v317_v11 = vpop.f32.mrf.mxu3 }
 0x139   : > { %v318_v14 = vadd.f32 %v317_v11, %v278_v51 }
 0x19b   : > { %v1158_v25 = vpop.permute.xlu0 %1157  ;;  %v1168_v40 = vpop.permute.xlu1 %1167 }
 0x19c   : > { %1162 = vrot.lane.b32.xlu0 %v1158_v25, %s1282_s29  ;;  %v1169_v42 = vunpack.i.l.bf16 %v1168_v40  ;;  %v1170_v43 = vunpack.i.h.bf16 %v1168_v40 }
 0x20e   : > { %v1163_v38 = vpop.permute.xlu0 %1162 }
 0x20f   : > { %v1164_v39 = vunpack.i.l.bf16 %v1163_v38  ;;  %v1165_v41 = vunpack.i.h.bf16 %v1163_v38 }
 0x211   : > { %362 = vmatpush.msrb.mxu2 %v1164_v39 }
 0x213   : > { %363 = vmatpush.msrb.mxu2 %v1165_v41 }
 0x215   : > { %364 = vmatpush.msrb.mxu2 %v1169_v42 }
 0x217   : > { %365 = vmatpush.msrb.mxu2 %v1170_v43 }
 0x218   : > { %1074 = vmatmul.msk.f32.vlgmr.msrb.gmra.mxu2 %vm164_vm0, %v1442_v44 }
 0x219   : > { %670 = vmatpush.msra.mxu2 %v605_v48 }
 0x21b   : > { %671 = vmatpush.msra.mxu2 %v604_v49 }
 0x220   : > { %1075 = vmatmul.msk.f32.gmra.mxu2 %vm164_vm0, %v1447_v45 }
 0x228   : > { %1076 = vmatmul.msk.f32.gmra.mxu2 %vm164_vm0, %v1452_v46 }
 0x230   : > { %1077 = vmatmul.msk.f32.gmra.mxu2 %vm164_vm0, %v1457_v47 }
 0x29b   : > { %v367_v55 = vpop.f32.mrf.mxu2 }
 0x29c   : > { %v379_v56 = vadd.f32 %v367_v55, %v309_v52  ;;  %463 = vrot.lane.b32.xlu0 %v367_v55, %s1282_s29 }
 0x29e   : > { %v513_v58 = vmul.f32 %v512_v54, %v379_v56  ;;  %v1078_v30 = vmul.f32 -1.442695, %v379_v56 }
 0x2a0   : > { %v518_v59 = vadd.f32 %v517_v57, %v513_v58 }
 0x2a2   : > { %v522_v61 = vmax.f32 %v518_v59, 0.0 }
 0x2a3   : > { %v370_v62 = vpop.f32.mrf.mxu2 }
 0x2a4   : > { %v528_v0 = vadd.f32 %v522_v61, %v225_v31  ;;  %v380_v1 = vadd.f32 %v370_v62, %v312_v60 }
 0x2a6   : > { %v514_v2 = vmul.f32 %v512_v54, %v380_v1  ;;  %1090 = vmatmul.msk.f32.vlgmr.msra.gmra.mxu2 %vm248_vm1, %v528_v0  ;;  %v1079_v29 = vmul.f32 -1.442695, %v380_v1 }
 0x2a8   : > { %v519_v3 = vadd.f32 %v517_v57, %v514_v2  ;;  %v241_v2 = vld [vmem:[%s1708_s1 + $0x28] sm:$0xff] }
 0x2a9   : > { %553 = vmatpush.msrb.mxu3 %v241_v2  ;;  %v599_v2 = vperm.slane %v1401_v16, 7 }
 0x2aa   : > { %v523_v5 = vmax.f32 %v519_v3, 0.0 }
 0x2ab   : > { %v373_v6 = vpop.f32.mrf.mxu2 }
 0x2ac   : > { %v381_v7 = vadd.f32 %v373_v6, %v315_v4  ;;  %467 = vrot.lane.b32.xlu2 %v373_v6, %s1282_s29  ;;  %v529_v10 = vadd.f32 %v523_v5, %v228_v33 }
 0x2ae   : > { %v515_v12 = vmul.f32 %v512_v54, %v381_v7  ;;  %1091 = vmatmul.msk.f32.gmra.mxu2 %vm248_vm1, %v529_v10  ;;  %v1080_v28 = vmul.f32 -1.442695, %v381_v7 }
 0x2b0   : > { %v520_v13 = vadd.f32 %v517_v57, %v515_v12 }
 0x2b2   : > { %v524_v15 = vmax.f32 %v520_v13, 0.0 }
 0x2b3   : > { %v376_v17 = vpop.f32.mrf.mxu2 }
 0x2b4   : > { %v382_v18 = vadd.f32 %v376_v17, %v318_v14  ;;  %465 = vrot.lane.b32.xlu2 %v370_v62, %s1282_s29  ;;  %469 = vrot.lane.b32.xlu1 %v376_v17, %s1282_s29  ;;  %v530_v21 = vadd.f32 %v524_v15, %v1433_v35 }
 0x2b6   : > { %v516_v22 = vmul.f32 %v512_v54, %v382_v18  ;;  %1092 = vmatmul.msk.f32.gmra.mxu2 %vm248_vm1, %v530_v21  ;;  %v1081_v27 = vmul.f32 -1.442695, %v382_v18 }
 0x2b8   : > { %v521_v23 = vadd.f32 %v517_v57, %v516_v22  ;;  %1186 = vpow2.f32 %v1081_v27 }
 0x2b9   : > { %1188 = vpow2.f32 %v1080_v28 }
 0x2ba   : > { %v525_v24 = vmax.f32 %v521_v23, 0.0  ;;  %1190 = vpow2.f32 %v1079_v29 }
 0x2bb   : > { %1192 = vpow2.f32 %v1078_v30 }
 0x2bc   : > { %v531_v25 = vadd.f32 %v525_v24, %v1437_v37 }
 0x2be   : > { %1093 = vmatmul.msk.f32.gmra.mxu2 %vm248_vm1, %v531_v25  ;;  %v1187_v31 = vpop.eup %1186 }
 0x2bf   : > { %v1189_v32 = vpop.eup %1188  ;;  %v398_v33 = vadd.f32 1.0, %v1187_v31 }
 0x2c0   : > { %v1191_v34 = vpop.eup %1190  ;;  %v397_v36 = vadd.f32 1.0, %v1189_v32 }
 0x2c1   : > { %v1193_v35 = vpop.eup %1192  ;;  %v1480_v38 = vadd.f32 1.0, %v1191_v34  ;;  %1194 = vrcp.f32 %v398_v33  ;;  %v455_v61 = vand.u32 2147483648, %v398_v33  ;;  %vm449_vm4 = vweird.f32 %v398_v33 }
 0x2c2   : > { %v1482_v37 = vadd.f32 1.0, %v1193_v35  ;;  %1196 = vrcp.f32 %v397_v36  ;;  %v453_v63 = vand.u32 2147483647, %v398_v33  ;;  %vm434_vm5 = vweird.f32 %v397_v36 }
 0x2c3   : > { %1198 = vrcp.f32 %v1480_v38  ;;  %v440_v0 = vand.u32 2147483648, %v397_v36  ;;  %v438_v3 = vand.u32 2147483647, %v397_v36  ;;  %vm419_vm10 = vweird.f32 %v1480_v38 }
 0x2c4   : > { %1200 = vrcp.f32 %v1482_v37  ;;  %v425_v7 = vand.u32 2147483648, %v1480_v38  ;;  %v456_v10 = vor.u32 1.1754944e-38, %v455_v61  ;;  %v423_v13 = vand.u32 2147483647, %v1480_v38 }
 0x2c5   : > { %vm454_vm11 = vcmp.eq.f32.partialorder %v453_v63, 8.507059e+37  ;;  %v441_v14 = vor.u32 1.1754944e-38, %v440_v0  ;;  %vm404_vm12 = vweird.f32 %v1482_v37  ;;  %v410_v15 = vand.u32 2147483648, %v1482_v37 }
 0x2c6   : > { %vm439_vm14 = vcmp.eq.f32.partialorder %v438_v3, 8.507059e+37  ;;  %v408_v22 = vand.u32 2147483647, %v1482_v37  ;;  %v426_v27 = vor.u32 1.1754944e-38, %v425_v7  ;;  %v564_v61 = vperm.slane %v1401_v16, 5 }
 0x2c7   : > { %v1195_v39 = vpop.eup %1194  ;;  %v411_v32 = vor.u32 1.1754944e-38, %v410_v15  ;;  %v596_v0 = vperm.slane %v1401_v16, 6 }
 0x2c8   : > { %v1197_v40 = vpop.eup %1196  ;;  %v445_v41 = vmul.f32 %v1195_v39, %v398_v33  ;;  %vm450_vm2 = vweird.f32 %v1195_v39 }
 0x2c9   : > { %v1199_v42 = vpop.eup %1198  ;;  %v430_v48 = vmul.f32 %v1197_v40, %v397_v36  ;;  %vm435_vm3 = vweird.f32 %v1197_v40  ;;  %vm1492_vm6 = vmor %vm449_vm4, %vm450_vm2  ;;  %vm424_vm2 = vcmp.eq.f32.partialorder %v423_v13, 8.507059e+37 }
 0x2ca   : > { %v1486_v43 = vpop.eup %1200  ;;  %v415_v49 = vmul.f32 %v1199_v42, %v1480_v38  ;;  %v446_v50 = vsub.f32 1.0, %v445_v41  ;;  %vm420_vm7 = vweird.f32 %v1199_v42  ;;  %vm1501_vm8 = vmor %vm434_vm5, %vm435_vm3  ;;  %vm409_vm3 = vcmp.eq.f32.partialorder %v408_v22, 8.507059e+37  ;;  %v1526_v38 = vld [vmem:[%s1367_s7 + $0x58] sm:$0xff] }
 0x2cb   : > { %v400_v51 = vmul.f32 %v1486_v43, %v1482_v37  ;;  %v431_v52 = vsub.f32 1.0, %v430_v48  ;;  %vm405_vm9 = vweird.f32 %v1486_v43  ;;  %vm1515_vm13 = vmor %vm419_vm10, %vm420_vm7  ;;  %v1531_v37 = vld [vmem:[%s1367_s7 + $0x60] sm:$0xff] }
 0x2cc   : > { %v416_v53 = vsub.f32 1.0, %v415_v49  ;;  %v447_v54 = vmul.f32 %v1195_v39, %v446_v50  ;;  %vm406_vm15 = vmor %vm404_vm12, %vm405_vm9 }
 0x2cd   : > { %v401_v55 = vsub.f32 1.0, %v400_v51  ;;  %v432_v56 = vmul.f32 %v1197_v40, %v431_v52 }
 0x2ce   : > { %v417_v58 = vmul.f32 %v1199_v42, %v416_v53  ;;  %v448_v59 = vadd.f32 %v1195_v39, %v447_v54  ;;  %v244_v53 = vld [vmem:[%s1708_s1 + $0x40] sm:$0xff] }
 0x2cf   : > { %v402_v60 = vmul.f32 %v1486_v43, %v401_v55  ;;  %v433_v62 = vadd.f32 %v1197_v40, %v432_v56 }
 0x2d0   : > { %v418_v4 = vadd.f32 %v1199_v42, %v417_v58  ;;  %v452_v5 = vsel %vm1492_vm6, %v1195_v39, %v448_v59  ;;  %v240_v39 = vld [vmem:[%s1708_s1 + $0x20] sm:$0xff] }
 0x2d1   : > { %v437_v11 = vsel %vm1501_vm8, %v1197_v40, %v433_v62  ;;  %v403_v12 = vadd.f32 %v1486_v43, %v402_v60  ;;  %v457_v21 = vsel %vm454_vm11, %v456_v10, %v452_v5  ;;  %554 = vmatpush.msrb.mxu3 %v240_v39  ;;  %v245_v40 = vld [vmem:[%s1708_s1 + $0x48] sm:$0xff]  ;;  %v602_v60 = vld [vmem:[%s1708_s1 + $0x58] sm:$0xff] }
 0x2d2   : > { %v422_v23 = vsel %vm1515_vm13, %v1199_v42, %v418_v4  ;;  %v442_v25 = vsel %vm439_vm14, %v441_v14, %v437_v11 }
 0x2d3   : > { %v407_v30 = vsel %vm406_vm15, %v1486_v43, %v403_v12  ;;  %v427_v33 = vsel %vm424_vm2, %v426_v27, %v422_v23 }
 0x2d4   : > { %v412_v35 = vsel %vm409_vm3, %v411_v32, %v407_v30 }
 0x306   : > { %v468_v57 = vpop.permute.xlu2 %467 }
 0x307   : > { %v477_v29 = vmul.f32 %v468_v57, %v442_v25 }
 0x30e   : > { %v466_v28 = vpop.permute.xlu2 %465  ;;  %v464_v31 = vpop.permute.xlu0 %463 }
 0x30f   : > { %v476_v34 = vmul.f32 %v466_v28, %v427_v33  ;;  %v475_v36 = vmul.f32 %v464_v31, %v412_v35 }
 0x326   : > { %v470_v18 = vpop.permute.xlu1 %469 }
 0x327   : > { %v478_v24 = vmul.f32 %v470_v18, %v457_v21 }
 0x329   : > { %497 = vmatpush.msrb.mxu0 %v478_v24 }
 0x32b   : > { %498 = vmatpush.msrb.mxu0 %v477_v29 }
 0x32d   : > { %499 = vmatpush.msrb.mxu0 %v476_v34 }
 0x32f   : > { %500 = vmatpush.msrb.mxu0 %v475_v36 }
 0x330   : > { %1082 = vmatmul.msk.f32.vlgmr.msrb.gmra.mxu0 %vm164_vm0, %v1526_v38 }
 0x331   : > { %583 = vmatpush.msra.mxu0 %v245_v40 }
 0x333   : > { %584 = vmatpush.msra.mxu0 %v244_v53 }
 0x338   : > { %1083 = vmatmul.msk.f32.gmra.mxu0 %vm164_vm0, %v1531_v37 }
 0x3ad   : > { %v502_v41 = vpop.f32.mrf.mxu0 }
 0x3ae   : > { %v508_v42 = vadd.f32 %v502_v41, %v1404_v19  ;;  %v243_v19 = vld [vmem:[%s1708_s1 + $0x38] sm:$0xff] }
 0x3af   : > { %585 = vmatpush.msra.mxu0 %v243_v19 }
 0x3b0   : > { %v510_v43 = vmax.f32 %v508_v42, 0.0 }
 0x3b2   : > { %v526_v48 = vadd.f32 %v510_v43, %v1376_v8  ;;  %v242_v8 = vld [vmem:[%s1708_s1 + $0x30] sm:$0xff] }
 0x3b3   : > { %586 = vmatpush.msra.mxu0 %v242_v8 }
 0x3b4   : > { %1084 = vmatmul.msk.f32.vlgmr.msrb.gmra.mxu3 %vm248_vm1, %v526_v48 }
 0x3b5   : > { %v505_v49 = vpop.f32.mrf.mxu0 }
 0x3b6   : > { %v509_v50 = vadd.f32 %v505_v49, %v1406_v20  ;;  %v532_v20 = vperm.slane %v1401_v16, 4  ;;  %v1579_v16 = vld [vmem:[%s1708_s1 + $0xa8] sm:$0xff] }
 0x3b7   : > { %v613_v13 = vperm.slane %v1579_v16, 0 }
 0x3b8   : > { %v511_v51 = vmax.f32 %v509_v50, 0.0 }
 0x3ba   : > { %v527_v52 = vadd.f32 %v511_v51, %v1380_v9  ;;  %v603_v9 = vld [vmem:[%s1708_s1 + $0x60] sm:$0xff] }
 0x3bb   : > { %634 = vmatpush.msrb.mxu1 %v603_v9 }
 0x3bc   : > { %1085 = vmatmul.msk.f32.gmra.mxu3 %vm248_vm1, %v527_v52 }
 0x3bd   : > { %635 = vmatpush.msrb.mxu1 %v602_v60 }
 0x437   : > { %v556_v54 = vpop.f32.mrf.mxu3 }
 0x438   : > { %v557_v55 = vadd.f32 %v556_v54, %v532_v20 }
 0x43a   : > { %v562_v56 = vmax.f32 %v557_v55, 0.0 }
 0x43c   : > { %1086 = vmatmul.msk.f32.vlgmr.msra.gmra.mxu0 %vm164_vm0, %v562_v56 }
 0x43f   : > { %v559_v57 = vpop.f32.mrf.mxu3 }
 0x440   : > { %v560_v58 = vadd.f32 %v559_v57, %v532_v20 }
 0x442   : > { %v563_v59 = vmax.f32 %v560_v58, 0.0 }
 0x444   : > { %1087 = vmatmul.msk.f32.gmra.mxu0 %vm164_vm0, %v563_v59 }
 0x4b9   : > { %v588_v62 = vpop.f32.mrf.mxu0 }
 0x4ba   : > { %v589_v63 = vadd.f32 %v588_v62, %v564_v61 }
 0x4bc   : > { %v594_v1 = vadd.f32 %v589_v63, %v526_v48 }
 0x4be   : > { %v597_v3 = vmul.f32 %v596_v0, %v594_v1 }
 0x4c0   : > { %v1568_v4 = vadd.f32 %v599_v2, %v597_v3 }
 0x4c1   : > { %v591_v5 = vpop.f32.mrf.mxu0 }
 0x4c2   : > { %v592_v6 = vadd.f32 %v591_v5, %v564_v61  ;;  %1088 = vmatmul.msk.f32.vlgmr.msrb.gmra.mxu1 %vm248_vm1, %v1568_v4 }
 0x4c4   : > { %v595_v7 = vadd.f32 %v592_v6, %v527_v52 }
 0x4c6   : > { %v598_v10 = vmul.f32 %v596_v0, %v595_v7 }
 0x4c8   : > { %v1572_v11 = vadd.f32 %v599_v2, %v598_v10 }
 0x4ca   : > { %1089 = vmatmul.msk.f32.gmra.mxu1 %vm248_vm1, %v1572_v11 }
 0x53f   : > { %v637_v12 = vpop.f32.mrf.mxu1 }
 0x540   : > { %v1582_v15 = vadd.f32 %v637_v12, %v613_v13 }
 0x547   : > { %v640_v14 = vpop.f32.mrf.mxu1 }
 0x548   : > { %v1584_v17 = vadd.f32 %v640_v14, %v613_v13 }
 0x54a   : > { %v1181_v18 = vpack.i.bf16 %v1582_v15, %v1584_v17 }
 0x54c   : > { %1182 = vrot.lane.b32.xlu0 %v1181_v18, %s1282_s29  ;;  %1172 = vrot.lane.b32.xlu1 %v1181_v18, %s1283_s30 }
 0x5be   : > { %v1173_v21 = vpop.permute.xlu1 %1172  ;;  %v1183_v24 = vpop.permute.xlu0 %1182 }
 0x5bf   : > { %1177 = vrot.lane.b32.xlu2 %v1173_v21, %s1282_s29  ;;  %v1184_v27 = vunpack.i.l.bf16 %v1183_v24  ;;  %v1185_v28 = vunpack.i.h.bf16 %v1183_v24  ;;  %v928_v21 = vperm.slane %v1579_v16, 7 }
 0x619   : > { %v1178_v22 = vpop.permute.xlu2 %1177 }
 0x61a   : > { %v1179_v23 = vunpack.i.l.bf16 %v1178_v22  ;;  %v1180_v25 = vunpack.i.h.bf16 %v1178_v22 }
 0x61c   : > { %715 = vmatpush.msra.mxu3 %v1179_v23 }
 0x61e   : > { %716 = vmatpush.msra.mxu3 %v1180_v25 }
 0x620   : > { %717 = vmatpush.msra.mxu3 %v1184_v27  ;;  %v931_v27 = vld [vmem:[%s1708_s1 + $0xf0] sm:$0xff] }
 0x622   : > { %718 = vmatpush.msra.mxu3 %v1185_v28 }
 0x623   : > { %1094 = vmatmul.msk.f32.vlgmr.msra.gmra.mxu3 %vm164_vm0, %v1442_v44  ;;  %v673_v44 = vpop.f32.mrf.mxu2 }
 0x62b   : > { %1095 = vmatmul.msk.f32.gmra.mxu3 %vm164_vm0, %v1447_v45  ;;  %v676_v45 = vpop.f32.mrf.mxu2 }
 0x633   : > { %1096 = vmatmul.msk.f32.gmra.mxu3 %vm164_vm0, %v1452_v46  ;;  %v679_v33 = vpop.f32.mrf.mxu2  ;;  %v643_v46 = vperm.slane %v1579_v16, 1 }
 0x635   : > { %v677_v39 = vadd.f32 %v676_v45, %v643_v46  ;;  %v674_v43 = vadd.f32 %v673_v44, %v643_v46 }
 0x63b   : > { %1097 = vmatmul.msk.f32.gmra.mxu3 %vm164_vm0, %v1457_v47  ;;  %v682_v34 = vpop.f32.mrf.mxu2  ;;  %v680_v47 = vadd.f32 %v679_v33, %v643_v46 }
 0x63c   : > { %v683_v35 = vadd.f32 %v682_v34, %v643_v46 }
 0x6a6   : > { %v720_v29 = vpop.f32.mrf.mxu3 }
 0x6a7   : > { %v732_v49 = vadd.f32 %v720_v29, %v674_v43 }
 0x6a9   : > { %v1098_v51 = vmul.f32 -1.442695, %v732_v49 }
 0x6ae   : > { %v723_v30 = vpop.f32.mrf.mxu3 }
 0x6af   : > { %818 = vrot.lane.b32.xlu0 %v723_v30, %s1282_s29  ;;  %v733_v41 = vadd.f32 %v723_v30, %v677_v39 }
 0x6b1   : > { %v1099_v50 = vmul.f32 -1.442695, %v733_v41 }
 0x6b6   : > { %v726_v31 = vpop.f32.mrf.mxu3 }
 0x6b7   : > { %820 = vrot.lane.b32.xlu2 %v726_v31, %s1282_s29  ;;  %v734_v40 = vadd.f32 %v726_v31, %v680_v47 }
 0x6b9   : > { %v1100_v48 = vmul.f32 -1.442695, %v734_v40 }
 0x6be   : > { %v729_v32 = vpop.f32.mrf.mxu3 }
 0x6bf   : > { %822 = vrot.lane.b32.xlu1 %v729_v32, %s1282_s29  ;;  %v735_v36 = vadd.f32 %v729_v32, %v683_v35 }
 0x6c1   : > { %v1101_v42 = vmul.f32 -1.442695, %v735_v36 }
 0x6c3   : > { %1202 = vpow2.f32 %v1101_v42 }
 0x6c4   : > { %1204 = vpow2.f32 %v1100_v48 }
 0x6c5   : > { %1206 = vpow2.f32 %v1099_v50 }
 0x6c6   : > { %1208 = vpow2.f32 %v1098_v51 }
 0x6c7   : > { %816 = vrot.lane.b32.xlu1 %v720_v29, %s1282_s29  ;;  %s1111_s29 = sshll.u32 %s1320_s13, 1 }
 0x6c8   : > { %s992_s25 = scalar_lea.hbm %s1709_s2, %s1111_s29 }
 0x6c9   : > { %v1203_v52 = vpop.eup %1202  ;;  %s996_s28 = sshll.u32 %s992_s25, 4  ;;  %s997_s28 = int_to_ptr.hbm [resolvable:$true] %s996_s28 }
 0x6ca   : > { %v1205_v53 = vpop.eup %1204  ;;  %v751_v19 = vadd.f32 1.0, %v1203_v52  ;;  %s1232_s4 = sshra.s32 %s997_s28, 4  ;;  %s1233_s4 = int_to_ptr.hbm [resolvable:$true] %s1232_s4 }
 0x6cb   : > { %v1207_v8 = vpop.eup %1206  ;;  %v750_v9 = vadd.f32 1.0, %v1205_v53  ;;  %s1234_s5 = scalar_lea.hbm %s1233_s4, 2  ;;  %p1239_p0 = scmp.lt.s32.totalorder %s1233_s4, %s1709_s2 }
 0x6cc   : > { %v1209_v20 = vpop.eup %1208  ;;  %v749_v54 = vadd.f32 1.0, %v1207_v8  ;;  %1210 = vrcp.f32 %v751_v19  ;;  %v808_v12 = vand.u32 2147483648, %v751_v19  ;;  %vm802_vm6 = vweird.f32 %v751_v19  ;;  %v607_v8 = vld [vmem:[%s1708_s1 + $0x80] sm:$0xff]  ;;  %p1235_p11 = scmp.ne.s32.totalorder %s1233_s4, %s1234_s5  ;;  %p1240_p1 = scmp.lt.s32.totalorder %s1238_s8, %s1234_s5 }
 0x6cd   : > { %1212 = vrcp.f32 %v750_v9  ;;  %v1604_v55 = vadd.f32 1.0, %v1209_v20  ;;  %v806_v14 = vand.u32 2147483647, %v751_v19  ;;  %v793_v18 = vand.u32 2147483648, %v750_v9  ;;  %882 = vmatpush.msra.mxu1 %v607_v8  ;;  %v611_v20 = vld [vmem:[%s1708_s1 + $0xa0] sm:$0xff] }
 0x6ce   : > { %1214 = vrcp.f32 %v749_v54  ;;  %vm787_vm9 = vweird.f32 %v750_v9  ;;  %v791_v23 = vand.u32 2147483647, %v750_v9  ;;  %v778_v28 = vand.u32 2147483648, %v749_v54  ;;  %p1236_p12 = pnand %p1235_p11, %p1337_p5  ;;  %p1241_p2 = por %p1240_p1, %p1239_p0 }
 0x6cf   : > { %1216 = vrcp.f32 %v1604_v55  ;;  %v809_v29 = vor.u32 1.1754944e-38, %v808_v12  ;;  %vm772_vm11 = vweird.f32 %v749_v54  ;;  %v776_v31 = vand.u32 2147483647, %v749_v54 }
 0x6d0   : > { %vm807_vm12 = vcmp.eq.f32.partialorder %v806_v14, 8.507059e+37  ;;  %v794_v44 = vor.u32 1.1754944e-38, %v793_v18  ;;  %vm792_vm15 = vcmp.eq.f32.partialorder %v791_v23, 8.507059e+37  ;;  %v779_v40 = vor.u32 1.1754944e-38, %v778_v28  ;;  %p1237_p13 = pneg %p1236_p12 }
 0x6d1   : > { %v763_v41 = vand.u32 2147483648, %v1604_v55  ;;  %vm777_vm2 = vcmp.eq.f32.partialorder %v776_v31, 8.507059e+37  ;;  %vm757_vm3 = vweird.f32 %v1604_v55  ;;  %v761_v43 = vand.u32 2147483647, %v1604_v55 }
 0x6d2   : > { %v1211_v56 = vpop.eup %1210  ;;  %p1242_p3 = pnand %p1241_p2, %p1237_p13 }
 0x6d3   : > { %v1213_v57 = vpop.eup %1212  ;;  %v798_v58 = vmul.f32 %v1211_v56, %v751_v19  ;;  %vm803_vm4 = vweird.f32 %v1211_v56  ;;  %v764_v51 = vor.u32 1.1754944e-38, %v763_v41 }
 0x6d4   : > { %v1215_v59 = vpop.eup %1214  ;;  %v783_v60 = vmul.f32 %v1213_v57, %v750_v9  ;;  %vm788_vm5 = vweird.f32 %v1213_v57  ;;  %vm1608_vm8 = vmor %vm802_vm6, %vm803_vm4  ;;  %v606_v9 = vld [vmem:[%s1708_s1 + $0x78] sm:$0xff] }
 0x6d5   : > { %v1217_v61 = vpop.eup %1216  ;;  %v768_v62 = vmul.f32 %v1215_v59, %v749_v54  ;;  %v799_v63 = vsub.f32 1.0, %v798_v58  ;;  %vm773_vm7 = vweird.f32 %v1215_v59  ;;  %vm1614_vm10 = vmor %vm787_vm9, %vm788_vm5  ;;  %vm762_vm5 = vcmp.eq.f32.partialorder %v761_v43, 8.507059e+37  ;;  %883 = vmatpush.msra.mxu1 %v606_v9 }
 0x6d6   : > { %v784_v0 = vsub.f32 1.0, %v783_v60  ;;  %v753_v1 = vmul.f32 %v1217_v61, %v1604_v55  ;;  %vm1621_vm13 = vmor %vm772_vm11, %vm773_vm7  ;;  %vm758_vm14 = vweird.f32 %v1217_v61  ;;  %v610_v60 = vld [vmem:[%s1708_s1 + $0x98] sm:$0xff] }
 0x6d7   : > { %v769_v2 = vsub.f32 1.0, %v768_v62  ;;  %v800_v3 = vmul.f32 %v1211_v56, %v799_v63  ;;  %vm759_vm4 = vmor %vm757_vm3, %vm758_vm14 }
 0x6d8   : > { %v785_v5 = vmul.f32 %v1213_v57, %v784_v0  ;;  %v754_v6 = vsub.f32 1.0, %v753_v1 }
 0x6d9   : > { %v770_v7 = vmul.f32 %v1215_v59, %v769_v2  ;;  %v801_v10 = vadd.f32 %v1211_v56, %v800_v3  ;;  %v893_v3 = vperm.slane %v1579_v16, 5 }
 0x6da   : > { %v786_v13 = vadd.f32 %v1213_v57, %v785_v5  ;;  %v755_v22 = vmul.f32 %v1217_v61, %v754_v6 }
 0x6db   : > { %v771_v24 = vadd.f32 %v1215_v59, %v770_v7  ;;  %v805_v25 = vsel %vm1608_vm8, %v1211_v56, %v801_v10  ;;  %v925_v10 = vperm.slane %v1579_v16, 6 }
 0x6dc   : > { %v790_v30 = vsel %vm1614_vm10, %v1213_v57, %v786_v13  ;;  %v810_v34 = vsel %vm807_vm12, %v809_v29, %v805_v25  ;;  %v756_v47 = vadd.f32 %v1217_v61, %v755_v22  ;;  %v932_v25 = vld [vmem:[%s1708_s1 + $0xf8] sm:$0xff] }
 0x6dd   : > { %v775_v46 = vsel %vm1621_vm13, %v1215_v59, %v771_v24  ;;  %v795_v36 = vsel %vm792_vm15, %v794_v44, %v790_v30  ;;  %v148_v24 = vld [vmem:[%s1367_s7 + $0x30] sm:$0x3] }
 0x6de   : > { %v780_v48 = vsel %vm777_vm2, %v779_v40, %v775_v46  ;;  %v760_v50 = vsel %vm759_vm4, %v1217_v61, %v756_v47 }
 0x6df   : > { %v765_v52 = vsel %vm762_vm5, %v764_v51, %v760_v50 }
 0x711   : > { %v821_v32 = vpop.permute.xlu2 %820 }
 0x712   : > { %v830_v42 = vmul.f32 %v821_v32, %v795_v36 }
 0x721   : > { %v819_v39 = vpop.permute.xlu0 %818 }
 0x722   : > { %v829_v49 = vmul.f32 %v819_v39, %v780_v48 }
 0x731   : > { %v823_v33 = vpop.permute.xlu1 %822 }
 0x732   : > { %v831_v35 = vmul.f32 %v823_v33, %v810_v34 }
 0x734   : > { %844 = vmatpush.msrb.mxu0 %v831_v35 }
 0x736   : > { %845 = vmatpush.msrb.mxu0 %v830_v42 }
 0x738   : > { %846 = vmatpush.msrb.mxu0 %v829_v49 }
 0x739   : > { %v817_v53 = vpop.permute.xlu1 %816 }
 0x73a   : > { %v828_v19 = vmul.f32 %v817_v53, %v765_v52 }
 0x73c   : > { %847 = vmatpush.msrb.mxu0 %v828_v19 }
 0x73d   : > { %1102 = vmatmul.msk.f32.vlgmr.msrb.gmra.mxu0 %vm164_vm0, %v1526_v38 }
 0x73e   : > { %912 = vmatpush.msra.mxu0 %v611_v20 }
 0x740   : > { %913 = vmatpush.msra.mxu0 %v610_v60 }
 0x745   : > { %1103 = vmatmul.msk.f32.gmra.mxu0 %vm164_vm0, %v1531_v37 }
 0x7ba   : > { %v849_v54 = vpop.f32.mrf.mxu0 }
 0x7bb   : > { %v855_v38 = vadd.f32 %v849_v54, %v1582_v15  ;;  %v609_v15 = vld [vmem:[%s1708_s1 + $0x90] sm:$0xff] }
 0x7bc   : > { %914 = vmatpush.msra.mxu0 %v609_v15 }
 0x7bd   : > { %v857_v55 = vmax.f32 %v855_v38, 0.0 }
 0x7bf   : > { %v859_v37 = vadd.f32 %v857_v55, %v1568_v4  ;;  %v608_v4 = vld [vmem:[%s1708_s1 + $0x88] sm:$0xff] }
 0x7c0   : > { %915 = vmatpush.msra.mxu0 %v608_v4 }
 0x7c1   : > { %1104 = vmatmul.msk.f32.vlgmr.msra.gmra.mxu1 %vm248_vm1, %v859_v37 }
 0x7c2   : > { %v852_v56 = vpop.f32.mrf.mxu0 }
 0x7c3   : > { %v856_v57 = vadd.f32 %v852_v56, %v1584_v17  ;;  %v861_v17 = vperm.slane %v1579_v16, 4  ;;  %v956_v16 = vperm.slane %v1422_v26, 1 }
 0x7c5   : > { %v858_v58 = vmax.f32 %v856_v57, 0.0 }
 0x7c7   : > { %v860_v59 = vadd.f32 %v858_v58, %v1572_v11 }
 0x7c9   : > { %1105 = vmatmul.msk.f32.gmra.mxu1 %vm248_vm1, %v860_v59 }
 0x83e   : > { %v885_v11 = vpop.f32.mrf.mxu1 }
 0x83f   : > { %v886_v61 = vadd.f32 %v885_v11, %v861_v17 }
 0x841   : > { %v891_v62 = vmax.f32 %v886_v61, 0.0 }
 0x843   : > { %1106 = vmatmul.msk.f32.vlgmr.msra.gmra.mxu0 %vm164_vm0, %v891_v62 }
 0x846   : > { %v888_v63 = vpop.f32.mrf.mxu1 }
 0x847   : > { %v889_v0 = vadd.f32 %v888_v63, %v861_v17 }
 0x849   : > { %v892_v1 = vmax.f32 %v889_v0, 0.0 }
 0x84b   : > { %1107 = vmatmul.msk.f32.gmra.mxu0 %vm164_vm0, %v892_v1 }
 0x8c0   : > { %v917_v2 = vpop.f32.mrf.mxu0 }
 0x8c1   : > { %v918_v5 = vadd.f32 %v917_v2, %v893_v3 }
 0x8c3   : > { %v923_v7 = vadd.f32 %v918_v5, %v859_v37 }
 0x8c5   : > { %v926_v14 = vmul.f32 %v925_v10, %v923_v7 }
 0x8c7   : > { %v929_v23 = vadd.f32 %v928_v21, %v926_v14 }
 0x8c8   : > { %v920_v6 = vpop.f32.mrf.mxu0 }
 0x8c9   : > { %v921_v12 = vadd.f32 %v920_v6, %v893_v3 }
 0x8cb   : > { %v924_v13 = vadd.f32 %v921_v12, %v860_v59 }
 0x8cd   : > { %v927_v18 = vmul.f32 %v925_v10, %v924_v13 }
 0x8cf   : > { %v930_v22 = vadd.f32 %v928_v21, %v927_v18 }
 0x8d1   : > { %950 = vmatpush.msrb.mxu1 %v930_v22 }
 0x8d3   : > { %951 = vmatpush.msrb.mxu1 %v929_v23 }
 0x8d4   : > { %1108 = vmatmul.msk.f32.vlgmr.msrb.gmra.mxu1 %vm248_vm1, %v148_v24 }
 0x8d5   : > { %974 = vmatpush.msra.mxu1 %v932_v25 }
 0x8d7   : > { %975 = vmatpush.msra.mxu1 %v931_v27 }
 0x951   : > { %v953_v28 = vpop.f32.mrf.mxu1 }
 0x952   : > { %1109 = vmatmul.msk.f32.vlgmr.msra.gmra.mxu1 %vm248_vm1, %v953_v28 }
 0x9cf   : > { %v977_v29 = vpop.f32.mrf.mxu1 }
 0x9d0   : > { %v978_v30 = vadd.f32 %v977_v29, %v956_v16 }
 0x9d2   : > { %980 = vst [vmem:[%s136_s26] sm:$0x3] %v978_v30 }
 0x9d3   : > { %1245 = shalt.err (!%p1242_p3)
}
 0x9d4   : > { %1115 = dma.vmem_to_hbm [thread:$0]  (%p1337_p5), %s995_s27, 32, %s997_s28, %s982_s3  }
 0x9d5 PF: > { %p1121_p4 = scmp.ge.s32.totalorder %s1280_s12, 2  ;;  %s1008_s17 = sand.u32 1, %s1268_s9  }
 0x9d6   : > { %s1009_s21 = scalar_lea.sflag [#allocation3], %s1008_s17 }
 0x9d7   : > { %p1118_p7 = pnand %p1121_p4, %p1341_p6 }
 0x9d9   : > { %p1119_p8 = pneg %p1118_p7 }
 0x9db   : > { %1263 = dma.done.wait (%p1119_p8), %s1009_s21, 32  }
 0x9dc   : > { %1265 = vsyncadd (%p1119_p8), %s1009_s21, 4294967264  ;;  %p12_p9 = scmp.ge.s32.totalorder %s1324_s15, 6   ;;  %s1724_s9 = smov %s1272_s10 }
 0x9dd   : > { %s1725_s10 = smov %s1276_s11  ;;  %s1726_s11 = smov %s1335_s18 }
 0x9de   : > { %s1727_s12 = smov %s1324_s15  ;;  %14 = sbr.rel (!%p12_p9) target bundleno = 3 (0x3), region = 63 }
 0x9e3   :  { %1015 = vsyncpa [#allocation3], 1 }
 0x9e4   :  { %1017 = vsyncpa [#allocation3 + $0x1], 1 }

</bundles_post_ra>
